<compile_context>
chip_gen: v6e
topology: v6e:2x2x1
jax: 0.10.0
libtpu: 0.0.40
codegen_flags: <defaults>
</compile_context>

<pallas_src>
import functools

import jax
import jax.numpy as jnp
from jax.experimental import pallas as pl
from jax.experimental.pallas import tpu as pltpu

EPS = 1e-5


def resblock_kernel(x_ref, m1_ref, m2_ref, gamma_ref, beta_ref, o_ref, *, H, C):
    NH, WC = x_ref.shape              # NH = N*H (sublanes), WC = W*C (lanes)
    W = WC // C
    inv_count = 1.0 / float(NH * W)   # BN count per channel = N*H*W

    x = x_ref[...].astype(jnp.float32)

    # Row masks implementing the zero padding in H (per image in the N*H flattening).
    row = jax.lax.broadcasted_iota(jnp.int32, (NH, WC), 0)
    h = row % H
    not_top = h != 0          # rows where the "h-1" tap is valid
    not_bot = h != H - 1      # rows where the "h+1" tap is valid

    def conv3x3(a, m_ref):
        # a_m1[r] = a[r-1], a_p1[r] = a[r+1]  (image boundaries zeroed by the masks).
        a_m1 = jnp.where(not_top, pltpu.roll(a, 1, 0), 0.0)
        a_p1 = jnp.where(not_bot, pltpu.roll(a, NH - 1, 0), 0.0)
        acc = jnp.dot(a_m1, m_ref[0], preferred_element_type=jnp.float32)
        acc = acc + jnp.dot(a, m_ref[1], preferred_element_type=jnp.float32)
        acc = acc + jnp.dot(a_p1, m_ref[2], preferred_element_type=jnp.float32)
        return acc

    def bn_stats(a):
        # One-pass stats: sum and sum-of-squares, reduced over rows, then group-
        # reduced (and broadcast back) over the W lane groups of each channel
        # with log2(W) lane rolls (channel c sits at lanes l with l % C == c).
        s = jnp.sum(a, axis=0, keepdims=True)        # (1, WC)
        sq = jnp.sum(a * a, axis=0, keepdims=True)   # (1, WC)
        k = C
        while k < WC:
            s = s + pltpu.roll(s, k, 1)
            sq = sq + pltpu.roll(sq, k, 1)
            k *= 2
        mu = s * inv_count
        var = sq * inv_count - mu * mu               # biased variance (train-mode BN)
        return mu, jax.lax.rsqrt(var + EPS)

    # conv1 -> bn1 (affine=False) -> relu
    y = conv3x3(x, m1_ref)
    mu1, r1 = bn_stats(y)
    y = jnp.maximum((y - mu1) * r1, 0.0)

    # conv2 -> bn2 (affine=True)
    z = conv3x3(y, m2_ref)
    mu2, r2 = bn_stats(z)
    z = (z - mu2) * r2 * gamma_ref[...] + beta_ref[...]

    # identity residual + relu; lane-dense (unmasked) store
    o_ref[...] = jnp.maximum(z + x, 0.0).astype(o_ref.dtype)


def _fold_conv3x3(w_oihw, W):
    """Fold the 3 horizontal taps + channel mixing of a 3x3 (pad=1) conv into three
    banded (W*Cin, W*Cout) matrices, one per vertical tap ky (host-side glue)."""
    w = jnp.transpose(w_oihw, (2, 3, 1, 0)).astype(jnp.float32)  # OIHW -> HWIO
    Kh, Kw, Cin, Cout = w.shape
    m = jnp.zeros((Kh, W * Cin, W * Cout), jnp.float32)
    for kx in range(Kw):
        for wo in range(W):
            wi = wo + kx - 1                                     # padding = 1
            if 0 <= wi < W:
                m = m.at[:, wi * Cin:(wi + 1) * Cin,
                         wo * Cout:(wo + 1) * Cout].set(w[:, kx])
    return m                                                     # (3, W*Cin, W*Cout)


def res_basic_block(x_nchw, w1_oihw, w2_oihw, gamma, beta):
    """PyTorch NCHW/OIHW interface; lane-dense (N*H, W*C) layout inside the kernel."""
    N, Cin, H, W = x_nchw.shape
    Cout = w1_oihw.shape[0]
    assert Cin == Cout, "identity residual requires in_ == out_ (downsample=None)"
    assert W & (W - 1) == 0, "lane-group reduce assumes W is a power of two"
    C = Cin
    WC = W * C
    NH = N * H

    # NCHW -> NHWC -> lane-dense (N*H, W*C)
    x = jnp.transpose(x_nchw, (0, 2, 3, 1)).astype(jnp.float32).reshape(NH, WC)
    m1 = _fold_conv3x3(w1_oihw, W)
    m2 = _fold_conv3x3(w2_oihw, W)
    g = jnp.tile(gamma.astype(jnp.float32), W).reshape(1, WC)    # lane l -> gamma[l % C]
    b = jnp.tile(beta.astype(jnp.float32), W).reshape(1, WC)

    kernel = functools.partial(resblock_kernel, H=H, C=C)
    out = pl.pallas_call(
        kernel,
        out_shape=jax.ShapeDtypeStruct((NH, WC), jnp.float32),
        grid=(1,),
        in_specs=[
            pl.BlockSpec((NH, WC), lambda i: (0, 0)),
            pl.BlockSpec((3, WC, WC), lambda i: (0, 0, 0)),
            pl.BlockSpec((3, WC, WC), lambda i: (0, 0, 0)),
            pl.BlockSpec((1, WC), lambda i: (0, 0)),
            pl.BlockSpec((1, WC), lambda i: (0, 0)),
        ],
        out_specs=pl.BlockSpec((NH, WC), lambda i: (0, 0)),
        compiler_params=pltpu.CompilerParams(dimension_semantics=("arbitrary",)),
    )(x, m1, m2, g, b)

    return jnp.transpose(out.reshape(N, H, W, C), (0, 3, 1, 2))  # -> NCHW


def reference(x, w1, w2, gamma, beta):
    """Pure-JAX reference (NCHW), mirrors PyTorch train-mode semantics."""
    def conv(a, w):
        return jax.lax.conv_general_dilated(
            a, w, window_strides=(1, 1), padding=((1, 1), (1, 1)),
            dimension_numbers=("NCHW", "OIHW", "NCHW"))

    def bn(a, g=None, b=None):
        mu = jnp.mean(a, axis=(0, 2, 3), keepdims=True)
        var = jnp.mean((a - mu) ** 2, axis=(0, 2, 3), keepdims=True)
        y = (a - mu) * jax.lax.rsqrt(var + EPS)
        if g is not None:
            y = y * g.reshape(1, -1, 1, 1) + b.reshape(1, -1, 1, 1)
        return y

    out = jax.nn.relu(bn(conv(x, w1)))
    out = bn(conv(out, w2), gamma, beta)
    return jax.nn.relu(out + x)


if __name__ == "__main__":
    # Small shapes consistent with the module (in_ == out_, identity residual).
    # C=8, W=16 makes the in-kernel lane axis exactly W*C = 128.
    N, C, H, W = 2, 8, 16, 16

    key = jax.random.PRNGKey(0)
    kx, k1, k2, kg, kb = jax.random.split(key, 5)
    x = jax.random.normal(kx, (N, C, H, W), jnp.float32)
    w1 = 0.1 * jax.random.normal(k1, (C, C, 3, 3), jnp.float32)   # conv1.weight (OIHW)
    w2 = 0.1 * jax.random.normal(k2, (C, C, 3, 3), jnp.float32)   # conv2.weight (OIHW)
    gamma = 1.0 + 0.1 * jax.random.normal(kg, (C,), jnp.float32)  # bn2.weight
    beta = 0.1 * jax.random.normal(kb, (C,), jnp.float32)         # bn2.bias

    out = jax.block_until_ready(res_basic_block(x, w1, w2, gamma, beta))
    ref = jax.block_until_ready(reference(x, w1, w2, gamma, beta))

    assert out.shape == (N, C, H, W)
    err = float(jnp.max(jnp.abs(out - ref)))
    assert jnp.allclose(out, ref, atol=2e-4, rtol=2e-4), err
    print("KERNEL_OK")
</pallas_src>

<mosaic_0001>
module attributes {stable_mosaic.version = 11 : i64} {
  func.func @resblock_kernel(%arg0: i32, %arg1: memref<32x128xf32, #tpu.memory_space<vmem>>, %arg2: memref<3x128x128xf32, #tpu.memory_space<vmem>>, %arg3: memref<3x128x128xf32, #tpu.memory_space<vmem>>, %arg4: memref<1x128xf32, #tpu.memory_space<vmem>>, %arg5: memref<1x128xf32, #tpu.memory_space<vmem>>, %arg6: memref<32x128xf32, #tpu.memory_space<vmem>>) attributes {dimension_semantics = [#tpu.dimension_semantics<arbitrary>], iteration_bounds = array<i64: 1>, scalar_prefetch = 0 : i64, scratch_operands = 0 : i64, tpu.core_type = #tpu.core_type<tc>, window_params = [{pipeline_mode = #tpu.pipeline_mode<synchronous>, transform_indices = @transform_0, window_bounds = array<i64: 32, 128>}, {pipeline_mode = #tpu.pipeline_mode<synchronous>, transform_indices = @transform_1, window_bounds = array<i64: 3, 128, 128>}, {pipeline_mode = #tpu.pipeline_mode<synchronous>, transform_indices = @transform_2, window_bounds = array<i64: 3, 128, 128>}, {pipeline_mode = #tpu.pipeline_mode<synchronous>, transform_indices = @transform_3, window_bounds = array<i64: 1, 128>}, {pipeline_mode = #tpu.pipeline_mode<synchronous>, transform_indices = @transform_4, window_bounds = array<i64: 1, 128>}, {pipeline_mode = #tpu.pipeline_mode<synchronous>, transform_indices = @transform_5, window_bounds = array<i64: 32, 128>}]} {
    %c0 = arith.constant 0 : index
    %c0_0 = arith.constant 0 : index
    %0 = vector.load %arg1[%c0, %c0_0] : memref<32x128xf32, #tpu.memory_space<vmem>>, vector<32x128xf32>
    %1 = tpu.iota {dimensions = array<i32: 0>} : vector<32x128xi32>
    %c16_i32 = arith.constant 16 : i32
    %c0_i32 = arith.constant 0 : i32
    %2 = arith.cmpi eq, %c16_i32, %c0_i32 : i32
    %c1_i32 = arith.constant 1 : i32
    %3 = arith.select %2, %c1_i32, %c16_i32 : i32
    %4 = vector.broadcast %3 : i32 to vector<32x128xi32>
    %5 = arith.remsi %1, %4 : vector<32x128xi32>
    %c0_i32_1 = arith.constant 0 : i32
    %6 = vector.broadcast %c0_i32_1 : i32 to vector<32x128xi32>
    %7 = arith.cmpi ne, %5, %6 : vector<32x128xi32>
    %c0_i32_2 = arith.constant 0 : i32
    %8 = vector.broadcast %c0_i32_2 : i32 to vector<32x128xi32>
    %9 = arith.cmpi slt, %5, %8 : vector<32x128xi32>
    %c0_i32_3 = arith.constant 0 : i32
    %10 = arith.cmpi slt, %3, %c0_i32_3 : i32
    %11 = vector.broadcast %10 : i1 to vector<32x128xi1>
    %12 = vector.broadcast %11 : vector<32x128xi1> to vector<32x128xi1>
    %13 = arith.xori %9, %12 : vector<32x128xi1>
    %14 = arith.andi %13, %7 : vector<32x128xi1>
    %15 = vector.broadcast %3 : i32 to vector<32x128xi32>
    %16 = arith.addi %5, %15 : vector<32x128xi32>
    %17 = arith.select %14, %16, %5 : vector<32x128xi1>, vector<32x128xi32>
    %c0_i32_4 = arith.constant 0 : i32
    %18 = vector.broadcast %c0_i32_4 : i32 to vector<32x128xi32>
    %19 = arith.cmpi ne, %17, %18 : vector<32x128xi32>
    %c15_i32 = arith.constant 15 : i32
    %20 = vector.broadcast %c15_i32 : i32 to vector<32x128xi32>
    %21 = arith.cmpi ne, %17, %20 : vector<32x128xi32>
    %c1_i32_5 = arith.constant 1 : i32
    %22 = tpu.dynamic_rotate %0 by %c1_i32_5 dim 0 : vector<32x128xf32>, i32 -> vector<32x128xf32>
    %cst = arith.constant 0.000000e+00 : f32
    %23 = vector.broadcast %cst : f32 to vector<32x128xf32>
    %24 = arith.select %19, %22, %23 : vector<32x128xi1>, vector<32x128xf32>
    %c31_i32 = arith.constant 31 : i32
    %25 = tpu.dynamic_rotate %0 by %c31_i32 dim 0 : vector<32x128xf32>, i32 -> vector<32x128xf32>
    %cst_6 = arith.constant 0.000000e+00 : f32
    %26 = vector.broadcast %cst_6 : f32 to vector<32x128xf32>
    %27 = arith.select %21, %25, %26 : vector<32x128xi1>, vector<32x128xf32>
    %c0_7 = arith.constant 0 : index
    %c0_8 = arith.constant 0 : index
    %c0_9 = arith.constant 0 : index
    %28 = vector.load %arg2[%c0_7, %c0_8, %c0_9] : memref<3x128x128xf32, #tpu.memory_space<vmem>>, vector<1x128x128xf32>
    %29 = vector.shape_cast %28 : vector<1x128x128xf32> to vector<128x128xf32>
    %cst_10 = arith.constant dense<0.000000e+00> : vector<32x128xf32>
    %30 = tpu.matmul %24, %29, %cst_10 {dimension_numbers = #tpu.dot_dimension_numbers<[1], [0], [0], [1], [0, 0, 1, 1], [], []>} : vector<32x128xf32>, vector<128x128xf32>, vector<32x128xf32> -> vector<32x128xf32>
    %c1 = arith.constant 1 : index
    %c0_11 = arith.constant 0 : index
    %c0_12 = arith.constant 0 : index
    %31 = vector.load %arg2[%c1, %c0_11, %c0_12] : memref<3x128x128xf32, #tpu.memory_space<vmem>>, vector<1x128x128xf32>
    %32 = vector.shape_cast %31 : vector<1x128x128xf32> to vector<128x128xf32>
    %cst_13 = arith.constant dense<0.000000e+00> : vector<32x128xf32>
    %33 = tpu.matmul %0, %32, %cst_13 {dimension_numbers = #tpu.dot_dimension_numbers<[1], [0], [0], [1], [0, 0, 1, 1], [], []>} : vector<32x128xf32>, vector<128x128xf32>, vector<32x128xf32> -> vector<32x128xf32>
    %34 = arith.addf %30, %33 : vector<32x128xf32>
    %c2 = arith.constant 2 : index
    %c0_14 = arith.constant 0 : index
    %c0_15 = arith.constant 0 : index
    %35 = vector.load %arg2[%c2, %c0_14, %c0_15] : memref<3x128x128xf32, #tpu.memory_space<vmem>>, vector<1x128x128xf32>
    %36 = vector.shape_cast %35 : vector<1x128x128xf32> to vector<128x128xf32>
    %cst_16 = arith.constant dense<0.000000e+00> : vector<32x128xf32>
    %37 = tpu.matmul %27, %36, %cst_16 {dimension_numbers = #tpu.dot_dimension_numbers<[1], [0], [0], [1], [0, 0, 1, 1], [], []>} : vector<32x128xf32>, vector<128x128xf32>, vector<32x128xf32> -> vector<32x128xf32>
    %38 = arith.addf %34, %37 : vector<32x128xf32>
    %cst_17 = arith.constant dense<0.000000e+00> : vector<128xf32>
    %39 = vector.multi_reduction <add>, %38, %cst_17 [0] : vector<32x128xf32> to vector<128xf32>
    %40 = vector.shape_cast %39 : vector<128xf32> to vector<1x128xf32>
    %41 = arith.mulf %38, %38 : vector<32x128xf32>
    %cst_18 = arith.constant dense<0.000000e+00> : vector<128xf32>
    %42 = vector.multi_reduction <add>, %41, %cst_18 [0] : vector<32x128xf32> to vector<128xf32>
    %43 = vector.shape_cast %42 : vector<128xf32> to vector<1x128xf32>
    %c8_i32 = arith.constant 8 : i32
    %44 = tpu.dynamic_rotate %40 by %c8_i32 dim 1 : vector<1x128xf32>, i32 -> vector<1x128xf32>
    %45 = arith.addf %40, %44 : vector<1x128xf32>
    %c8_i32_19 = arith.constant 8 : i32
    %46 = tpu.dynamic_rotate %43 by %c8_i32_19 dim 1 : vector<1x128xf32>, i32 -> vector<1x128xf32>
    %47 = arith.addf %43, %46 : vector<1x128xf32>
    %c16_i32_20 = arith.constant 16 : i32
    %48 = tpu.dynamic_rotate %45 by %c16_i32_20 dim 1 : vector<1x128xf32>, i32 -> vector<1x128xf32>
    %49 = arith.addf %45, %48 : vector<1x128xf32>
    %c16_i32_21 = arith.constant 16 : i32
    %50 = tpu.dynamic_rotate %47 by %c16_i32_21 dim 1 : vector<1x128xf32>, i32 -> vector<1x128xf32>
    %51 = arith.addf %47, %50 : vector<1x128xf32>
    %c32_i32 = arith.constant 32 : i32
    %52 = tpu.dynamic_rotate %49 by %c32_i32 dim 1 : vector<1x128xf32>, i32 -> vector<1x128xf32>
    %53 = arith.addf %49, %52 : vector<1x128xf32>
    %c32_i32_22 = arith.constant 32 : i32
    %54 = tpu.dynamic_rotate %51 by %c32_i32_22 dim 1 : vector<1x128xf32>, i32 -> vector<1x128xf32>
    %55 = arith.addf %51, %54 : vector<1x128xf32>
    %c64_i32 = arith.constant 64 : i32
    %56 = tpu.dynamic_rotate %53 by %c64_i32 dim 1 : vector<1x128xf32>, i32 -> vector<1x128xf32>
    %57 = arith.addf %53, %56 : vector<1x128xf32>
    %c64_i32_23 = arith.constant 64 : i32
    %58 = tpu.dynamic_rotate %55 by %c64_i32_23 dim 1 : vector<1x128xf32>, i32 -> vector<1x128xf32>
    %59 = arith.addf %55, %58 : vector<1x128xf32>
    %cst_24 = arith.constant 0.001953125 : f32
    %60 = vector.broadcast %cst_24 : f32 to vector<1x128xf32>
    %61 = arith.mulf %57, %60 : vector<1x128xf32>
    %cst_25 = arith.constant 0.001953125 : f32
    %62 = vector.broadcast %cst_25 : f32 to vector<1x128xf32>
    %63 = arith.mulf %59, %62 : vector<1x128xf32>
    %64 = arith.mulf %61, %61 : vector<1x128xf32>
    %65 = arith.subf %63, %64 : vector<1x128xf32>
    %cst_26 = arith.constant 9.99999974E-6 : f32
    %66 = vector.broadcast %cst_26 : f32 to vector<1x128xf32>
    %67 = arith.addf %65, %66 : vector<1x128xf32>
    %68 = math.rsqrt %67 : vector<1x128xf32>
    %69 = vector.broadcast %61 : vector<1x128xf32> to vector<32x128xf32>
    %70 = arith.subf %38, %69 : vector<32x128xf32>
    %71 = vector.broadcast %68 : vector<1x128xf32> to vector<32x128xf32>
    %72 = arith.mulf %70, %71 : vector<32x128xf32>
    %cst_27 = arith.constant 0.000000e+00 : f32
    %73 = vector.broadcast %cst_27 : f32 to vector<32x128xf32>
    %74 = arith.maximumf %72, %73 : vector<32x128xf32>
    %c1_i32_28 = arith.constant 1 : i32
    %75 = tpu.dynamic_rotate %74 by %c1_i32_28 dim 0 : vector<32x128xf32>, i32 -> vector<32x128xf32>
    %cst_29 = arith.constant 0.000000e+00 : f32
    %76 = vector.broadcast %cst_29 : f32 to vector<32x128xf32>
    %77 = arith.select %19, %75, %76 : vector<32x128xi1>, vector<32x128xf32>
    %c31_i32_30 = arith.constant 31 : i32
    %78 = tpu.dynamic_rotate %74 by %c31_i32_30 dim 0 : vector<32x128xf32>, i32 -> vector<32x128xf32>
    %cst_31 = arith.constant 0.000000e+00 : f32
    %79 = vector.broadcast %cst_31 : f32 to vector<32x128xf32>
    %80 = arith.select %21, %78, %79 : vector<32x128xi1>, vector<32x128xf32>
    %c0_32 = arith.constant 0 : index
    %c0_33 = arith.constant 0 : index
    %c0_34 = arith.constant 0 : index
    %81 = vector.load %arg3[%c0_32, %c0_33, %c0_34] : memref<3x128x128xf32, #tpu.memory_space<vmem>>, vector<1x128x128xf32>
    %82 = vector.shape_cast %81 : vector<1x128x128xf32> to vector<128x128xf32>
    %cst_35 = arith.constant dense<0.000000e+00> : vector<32x128xf32>
    %83 = tpu.matmul %77, %82, %cst_35 {dimension_numbers = #tpu.dot_dimension_numbers<[1], [0], [0], [1], [0, 0, 1, 1], [], []>} : vector<32x128xf32>, vector<128x128xf32>, vector<32x128xf32> -> vector<32x128xf32>
    %c1_36 = arith.constant 1 : index
    %c0_37 = arith.constant 0 : index
    %c0_38 = arith.constant 0 : index
    %84 = vector.load %arg3[%c1_36, %c0_37, %c0_38] : memref<3x128x128xf32, #tpu.memory_space<vmem>>, vector<1x128x128xf32>
    %85 = vector.shape_cast %84 : vector<1x128x128xf32> to vector<128x128xf32>
    %cst_39 = arith.constant dense<0.000000e+00> : vector<32x128xf32>
    %86 = tpu.matmul %74, %85, %cst_39 {dimension_numbers = #tpu.dot_dimension_numbers<[1], [0], [0], [1], [0, 0, 1, 1], [], []>} : vector<32x128xf32>, vector<128x128xf32>, vector<32x128xf32> -> vector<32x128xf32>
    %87 = arith.addf %83, %86 : vector<32x128xf32>
    %c2_40 = arith.constant 2 : index
    %c0_41 = arith.constant 0 : index
    %c0_42 = arith.constant 0 : index
    %88 = vector.load %arg3[%c2_40, %c0_41, %c0_42] : memref<3x128x128xf32, #tpu.memory_space<vmem>>, vector<1x128x128xf32>
    %89 = vector.shape_cast %88 : vector<1x128x128xf32> to vector<128x128xf32>
    %cst_43 = arith.constant dense<0.000000e+00> : vector<32x128xf32>
    %90 = tpu.matmul %80, %89, %cst_43 {dimension_numbers = #tpu.dot_dimension_numbers<[1], [0], [0], [1], [0, 0, 1, 1], [], []>} : vector<32x128xf32>, vector<128x128xf32>, vector<32x128xf32> -> vector<32x128xf32>
    %91 = arith.addf %87, %90 : vector<32x128xf32>
    %cst_44 = arith.constant dense<0.000000e+00> : vector<128xf32>
    %92 = vector.multi_reduction <add>, %91, %cst_44 [0] : vector<32x128xf32> to vector<128xf32>
    %93 = vector.shape_cast %92 : vector<128xf32> to vector<1x128xf32>
    %94 = arith.mulf %91, %91 : vector<32x128xf32>
    %cst_45 = arith.constant dense<0.000000e+00> : vector<128xf32>
    %95 = vector.multi_reduction <add>, %94, %cst_45 [0] : vector<32x128xf32> to vector<128xf32>
    %96 = vector.shape_cast %95 : vector<128xf32> to vector<1x128xf32>
    %c8_i32_46 = arith.constant 8 : i32
    %97 = tpu.dynamic_rotate %93 by %c8_i32_46 dim 1 : vector<1x128xf32>, i32 -> vector<1x128xf32>
    %98 = arith.addf %93, %97 : vector<1x128xf32>
    %c8_i32_47 = arith.constant 8 : i32
    %99 = tpu.dynamic_rotate %96 by %c8_i32_47 dim 1 : vector<1x128xf32>, i32 -> vector<1x128xf32>
    %100 = arith.addf %96, %99 : vector<1x128xf32>
    %c16_i32_48 = arith.constant 16 : i32
    %101 = tpu.dynamic_rotate %98 by %c16_i32_48 dim 1 : vector<1x128xf32>, i32 -> vector<1x128xf32>
    %102 = arith.addf %98, %101 : vector<1x128xf32>
    %c16_i32_49 = arith.constant 16 : i32
    %103 = tpu.dynamic_rotate %100 by %c16_i32_49 dim 1 : vector<1x128xf32>, i32 -> vector<1x128xf32>
    %104 = arith.addf %100, %103 : vector<1x128xf32>
    %c32_i32_50 = arith.constant 32 : i32
    %105 = tpu.dynamic_rotate %102 by %c32_i32_50 dim 1 : vector<1x128xf32>, i32 -> vector<1x128xf32>
    %106 = arith.addf %102, %105 : vector<1x128xf32>
    %c32_i32_51 = arith.constant 32 : i32
    %107 = tpu.dynamic_rotate %104 by %c32_i32_51 dim 1 : vector<1x128xf32>, i32 -> vector<1x128xf32>
    %108 = arith.addf %104, %107 : vector<1x128xf32>
    %c64_i32_52 = arith.constant 64 : i32
    %109 = tpu.dynamic_rotate %106 by %c64_i32_52 dim 1 : vector<1x128xf32>, i32 -> vector<1x128xf32>
    %110 = arith.addf %106, %109 : vector<1x128xf32>
    %c64_i32_53 = arith.constant 64 : i32
    %111 = tpu.dynamic_rotate %108 by %c64_i32_53 dim 1 : vector<1x128xf32>, i32 -> vector<1x128xf32>
    %112 = arith.addf %108, %111 : vector<1x128xf32>
    %cst_54 = arith.constant 0.001953125 : f32
    %113 = vector.broadcast %cst_54 : f32 to vector<1x128xf32>
    %114 = arith.mulf %110, %113 : vector<1x128xf32>
    %cst_55 = arith.constant 0.001953125 : f32
    %115 = vector.broadcast %cst_55 : f32 to vector<1x128xf32>
    %116 = arith.mulf %112, %115 : vector<1x128xf32>
    %117 = arith.mulf %114, %114 : vector<1x128xf32>
    %118 = arith.subf %116, %117 : vector<1x128xf32>
    %cst_56 = arith.constant 9.99999974E-6 : f32
    %119 = vector.broadcast %cst_56 : f32 to vector<1x128xf32>
    %120 = arith.addf %118, %119 : vector<1x128xf32>
    %121 = math.rsqrt %120 : vector<1x128xf32>
    %122 = vector.broadcast %114 : vector<1x128xf32> to vector<32x128xf32>
    %123 = arith.subf %91, %122 : vector<32x128xf32>
    %124 = vector.broadcast %121 : vector<1x128xf32> to vector<32x128xf32>
    %125 = arith.mulf %123, %124 : vector<32x128xf32>
    %c0_57 = arith.constant 0 : index
    %c0_58 = arith.constant 0 : index
    %126 = vector.load %arg4[%c0_57, %c0_58] : memref<1x128xf32, #tpu.memory_space<vmem>>, vector<1x128xf32>
    %127 = vector.broadcast %126 : vector<1x128xf32> to vector<32x128xf32>
    %128 = arith.mulf %125, %127 : vector<32x128xf32>
    %c0_59 = arith.constant 0 : index
    %c0_60 = arith.constant 0 : index
    %129 = vector.load %arg5[%c0_59, %c0_60] : memref<1x128xf32, #tpu.memory_space<vmem>>, vector<1x128xf32>
    %130 = vector.broadcast %129 : vector<1x128xf32> to vector<32x128xf32>
    %131 = arith.addf %128, %130 : vector<32x128xf32>
    %132 = arith.addf %131, %0 : vector<32x128xf32>
    %cst_61 = arith.constant 0.000000e+00 : f32
    %133 = vector.broadcast %cst_61 : f32 to vector<32x128xf32>
    %134 = arith.maximumf %132, %133 : vector<32x128xf32>
    %c0_62 = arith.constant 0 : index
    %c0_63 = arith.constant 0 : index
    %135 = vector.load %arg6[%c0_62, %c0_63] : memref<32x128xf32, #tpu.memory_space<vmem>>, vector<32x128xf32>
    tpu.vector_store %arg6[%c0_62, %c0_63], %134 {strides = array<i32>} : memref<32x128xf32, #tpu.memory_space<vmem>>, vector<32x128xf32>,
    return
  }
  func.func @transform_0(%arg0: i32) -> (i32, i32) {
    %c0_i32 = arith.constant 0 : i32
    %c0_i32_0 = arith.constant 0 : i32
    %c0_i32_1 = arith.constant 0 : i32
    return %c0_i32, %c0_i32_0 : i32, i32
  }
  func.func @transform_1(%arg0: i32) -> (i32, i32, i32) {
    %c0_i32 = arith.constant 0 : i32
    %c0_i32_0 = arith.constant 0 : i32
    %c0_i32_1 = arith.constant 0 : i32
    %c0_i32_2 = arith.constant 0 : i32
    return %c0_i32, %c0_i32_0, %c0_i32_1 : i32, i32, i32
  }
  func.func @transform_2(%arg0: i32) -> (i32, i32, i32) {
    %c0_i32 = arith.constant 0 : i32
    %c0_i32_0 = arith.constant 0 : i32
    %c0_i32_1 = arith.constant 0 : i32
    %c0_i32_2 = arith.constant 0 : i32
    return %c0_i32, %c0_i32_0, %c0_i32_1 : i32, i32, i32
  }
  func.func @transform_3(%arg0: i32) -> (i32, i32) {
    %c0_i32 = arith.constant 0 : i32
    %c0_i32_0 = arith.constant 0 : i32
    %c0_i32_1 = arith.constant 0 : i32
    return %c0_i32, %c0_i32_0 : i32, i32
  }
  func.func @transform_4(%arg0: i32) -> (i32, i32) {
    %c0_i32 = arith.constant 0 : i32
    %c0_i32_0 = arith.constant 0 : i32
    %c0_i32_1 = arith.constant 0 : i32
    return %c0_i32, %c0_i32_0 : i32, i32
  }
  func.func @transform_5(%arg0: i32) -> (i32, i32) {
    %c0_i32 = arith.constant 0 : i32
    %c0_i32_0 = arith.constant 0 : i32
    %c0_i32_1 = arith.constant 0 : i32
    return %c0_i32, %c0_i32_0 : i32, i32
  }
}

</mosaic_0001>

<bundles_post_ra>
// kernel: tpu_custom_call.1
= control target key start
LH: loop header
LB: loop body
LE: loop exit
PB: predicated region body
PF: predicated region fallthrough
CT: control target
= control target key end

     0   :  { %10 = vsyncpa [#allocation3], 0  ;;  %s1710_s0 = inlined_call_operand.hbm [shape: f32[32,128], index: 0, kind: input, shape index: {}]   ;;  %s1711_s1 = inlined_call_operand.hbm [shape: f32[3,128,128], index: 1, kind: input, shape index: {}]   ;;  %s1712_s2 = inlined_call_operand.hbm [shape: f32[3,128,128], index: 2, kind: input, shape index: {}]   ;;  %s1713_s3 = inlined_call_operand.vmem [shape: f32[1,128], index: 3, kind: input, shape index: {}]   ;;  %s1714_s4 = inlined_call_operand.vmem [shape: f32[1,128], index: 4, kind: input, shape index: {}]   ;;  %s1715_s5 = inlined_call_operand.hbm [shape: f32[32,128], index: 5, kind: output, shape index: {}]  }
   0x1   :  { %11 = vsyncpa [#allocation6], 0 }
   0x2   :  { %12 = vsyncpa [#allocation4], 0  ;;  %s1444_s18 = smov [#allocation5]   ;;  %s1445_s20 = smov [#allocation2]  }
   0x3   :  { %s30_s19 = sshll.u32 %s1444_s18, 4  ;;  %s18_s21 = sshll.u32 %s1445_s20, 4  ;;  %s31_s19 = int_to_ptr.vmem [resolvable:$true] %s30_s19  ;;  %s19_s21 = int_to_ptr.vmem [resolvable:$true] %s18_s21 }
   0x4   :  { %s1366_s22 = scalar_lea.vmem %s31_s19, 6144  ;;  %p1371_p1 = scmp.lt.s32.totalorder %s31_s19, %s31_s19 }
   0x5   :  { %p1367_p0 = scmp.ne.s32.totalorder %s31_s19, %s1366_s22  ;;  %p1372_p2 = scmp.lt.s32.totalorder %s1366_s22, %s1366_s22 }
   0x7   :  { %p1373_p3 = por %p1372_p2, %p1371_p1 }
   0x9   :  { %p1374_p4 = pnand %p1373_p3, %p1367_p0 }
   0xb   :  { %1377 = shalt.err (!%p1374_p4)
}
   0xc   :  { %s1446_s23 = smov 128   ;;  %s1447_s24 = smov 8  }
   0xd   :  { %36 = dma.hbm_to_vmem [thread:$0]  %s1711_s1, 6144, %s31_s19, [#allocation6], %s1446_s23, %s1446_s23, %s1447_s24  }
   0xe   :  { %s1386_s27 = scalar_lea.vmem %s19_s21, 512  ;;  %p1391_p6 = scmp.lt.s32.totalorder %s19_s21, %s19_s21 }
   0xf   :  { %p1387_p5 = scmp.ne.s32.totalorder %s19_s21, %s1386_s27  ;;  %p1392_p7 = scmp.lt.s32.totalorder %s1386_s27, %s1386_s27 }
  0x11   :  { %p1393_p8 = por %p1392_p7, %p1391_p6 }
  0x13   :  { %p1394_p9 = pnand %p1393_p8, %p1387_p5 }
  0x15   :  { %1397 = shalt.err (!%p1394_p9)
}
  0x16   :  { %24 = dma.hbm_to_vmem [thread:$0]  %s1710_s0, 512, %s19_s21, [#allocation3], %s1446_s23, %s1446_s23, %s1447_s24  }
  0x17   :  { %s1448_s30 = smov [#allocation7]  }
  0x18   :  { %s42_s6 = sshll.u32 %s1448_s30, 4  ;;  %s43_s6 = int_to_ptr.vmem [resolvable:$true] %s42_s6 }
  0x19   :  { %s1406_s7 = scalar_lea.vmem %s43_s6, 6144  ;;  %p1411_p11 = scmp.lt.s32.totalorder %s43_s6, %s43_s6 }
  0x1a   :  { %p1407_p10 = scmp.ne.s32.totalorder %s43_s6, %s1406_s7  ;;  %p1412_p12 = scmp.lt.s32.totalorder %s1406_s7, %s1406_s7 }
  0x1c   :  { %p1413_p13 = por %p1412_p12, %p1411_p11 }
  0x1e   :  { %p1414_p0 = pnand %p1413_p13, %p1407_p10 }
  0x20   :  { %1417 = shalt.err (!%p1414_p0)
}
  0x21   :  { %48 = dma.hbm_to_vmem [thread:$0]  %s1712_s2, 6144, %s43_s6, [#allocation6], %s1446_s23, %s1446_s23, %s1447_s24  }
  0x22   :  { %1438 = dma.done.wait [#allocation3], 512  }
  0x23   :  { %1439 = vsyncadd [#allocation3], 4294966784 }
  0x24   :  { %1440 = dma.done.wait [#allocation6], 12288  }
  0x25   :  { %1441 = vsyncadd [#allocation6], 4294955008  ;;  %v185_v0 = vld [vmem:[#allocation5 + $0xf8] sm:$0xff]  ;;  %v184_v2 = vld [vmem:[#allocation5 + $0xf0] sm:$0xff]  ;;  %v66_v22 = vlaneseq  ;;  %s1449_s0 = smov 16   ;;  %s1450_s2 = smov 32  }
  0x26   :  { %v168_v1 = vld [vmem:[#allocation5 + $0x78] sm:$0xff]  ;;  %1117 = vmatprep.subr.mxu0 %v185_v0  ;;  %v167_v3 = vld [vmem:[#allocation5 + $0x70] sm:$0xff]  ;;  %v183_v4 = vld [vmem:[#allocation5 + $0xe8] sm:$0xff]  ;;  %s1451_s9 = smov 64   ;;  %s1452_s14 = smov [#allocation8]  }
  0x27   :  { %1155 = vmatprep.subr.mxu1 %v168_v1  ;;  %1118 = vmatpush3.msra.mxu0 %v185_v0  ;;  %v166_v5 = vld [vmem:[#allocation5 + $0x68] sm:$0xff]  ;;  %v182_v6 = vld [vmem:[#allocation5 + $0xe0] sm:$0xff]  ;;  %v181_v8 = vld [vmem:[#allocation5 + $0xd8] sm:$0xff]  ;;  %v1501_v27 = vshrl.u32 %v66_v22, 7  ;;  %s974_s15 = sshll.u32 %s1452_s14, 4  ;;  %s975_s15 = int_to_ptr.vmem [resolvable:$true] %s974_s15 }
  0x28   :  { %1156 = vmatpush3.msra.mxu1 %v168_v1  ;;  %1119 = vmatprep.subr.mxu0 %v184_v2  ;;  %v165_v7 = vld [vmem:[#allocation5 + $0x60] sm:$0xff]  ;;  %v164_v9 = vld [vmem:[#allocation5 + $0x58] sm:$0xff]  ;;  %v180_v10 = vld [vmem:[#allocation5 + $0xd0] sm:$0xff]  ;;  %p1423_p2 = scmp.lt.s32.totalorder %s975_s15, %s975_s15 }
  0x29   :  { %1157 = vmatprep.subr.mxu1 %v167_v3  ;;  %1120 = vmatpush3.msra.mxu0 %v184_v2  ;;  %v163_v11 = vld [vmem:[#allocation5 + $0x50] sm:$0xff]  ;;  %v179_v12 = vld [vmem:[#allocation5 + $0xc8] sm:$0xff]  ;;  %v178_v14 = vld [vmem:[#allocation5 + $0xc0] sm:$0xff]  ;;  %v69_v33 = vadd.s32 16, %v1501_v27  ;;  %v75_v36 = vand.u32 15, %v1501_v27  ;;  %vm131_vm0 = vcmp.lt.s32.totalorder %v1501_v27, 1 }
  0x2a   :  { %1158 = vmatpush3.msra.mxu1 %v167_v3  ;;  %1121 = vmatprep.subr.mxu0 %v183_v4  ;;  %v162_v13 = vld [vmem:[#allocation5 + $0x48] sm:$0xff]  ;;  %v161_v15 = vld [vmem:[#allocation5 + $0x40] sm:$0xff]  ;;  %v177_v16 = vld [vmem:[#allocation5 + $0xb8] sm:$0xff]  ;;  %vm144_vm3 = vcmp.lt.s32.totalorder %v1501_v27, 7  ;;  %v68_v3 = vadd.s32 8, %v1501_v27 }
  0x2b   :  { %1159 = vmatprep.subr.mxu1 %v166_v5  ;;  %1122 = vmatpush3.msra.mxu0 %v183_v4  ;;  %v160_v17 = vld [vmem:[#allocation5 + $0x38] sm:$0xff]  ;;  %v176_v18 = vld [vmem:[#allocation5 + $0xb0] sm:$0xff]  ;;  %v175_v20 = vld [vmem:[#allocation5 + $0xa8] sm:$0xff]  ;;  %v89_v44 = vand.u32 15, %v69_v33  ;;  %vm1518_vm1 = vcmp.ne.s32.totalorder %v75_v36, 0 }
  0x2c   :  { %1160 = vmatpush3.msra.mxu1 %v166_v5  ;;  %1123 = vmatprep.subr.mxu0 %v182_v6  ;;  %v159_v19 = vld [vmem:[#allocation5 + $0x30] sm:$0xff]  ;;  %v158_v21 = vld [vmem:[#allocation5 + $0x28] sm:$0xff]  ;;  %v174_v23 = vld [vmem:[#allocation5 + $0xa0] sm:$0xff] }
  0x2d   :  { %1161 = vmatprep.subr.mxu1 %v165_v7  ;;  %1124 = vmatpush3.msra.mxu0 %v182_v6  ;;  %v157_v24 = vld [vmem:[#allocation5 + $0x20] sm:$0xff]  ;;  %v173_v25 = vld [vmem:[#allocation5 + $0x98] sm:$0xff]  ;;  %v172_v30 = vld [vmem:[#allocation5 + $0x90] sm:$0xff]  ;;  %vm1529_vm2 = vcmp.ne.s32.totalorder %v89_v44, 0 }
  0x2e   :  { %1162 = vmatpush3.msra.mxu1 %v165_v7  ;;  %1125 = vmatprep.subr.mxu0 %v181_v8  ;;  %v156_v26 = vld [vmem:[#allocation5 + $0x18] sm:$0xff]  ;;  %v1503_v28 = vld [vmem:[#allocation2] sm:$0xff]  ;;  %v155_v31 = vld [vmem:[#allocation5 + $0x10] sm:$0xff]  ;;  %v82_v7 = vand.u32 15, %v68_v3 }
  0x2f   :  { %1163 = vmatprep.subr.mxu1 %v164_v9  ;;  %1126 = vmatpush3.msra.mxu0 %v181_v8  ;;  %v1505_v29 = vld [vmem:[#allocation2 + $0x18] sm:$0xff]  ;;  %v1507_v32 = vld [vmem:[#allocation2 + $0x8] sm:$0xff]  ;;  %v127_v37 = vrot.slane %v1503_v28, 7  ;;  %v1513_v39 = vld [vmem:[#allocation2 + $0x10] sm:$0xff]  ;;  %v140_v51 = vrot.slane %v1503_v28, 1  ;;  %v70_v8 = vadd.s32 24, %v1501_v27 }
  0x30   :  { %1164 = vmatpush3.msra.mxu1 %v164_v9  ;;  %1127 = vmatprep.subr.mxu0 %v180_v10  ;;  %v171_v34 = vld [vmem:[#allocation5 + $0x88] sm:$0xff]  ;;  %v130_v38 = vrot.slane %v1505_v29, 7  ;;  %v128_v40 = vrot.slane %v1507_v32, 7  ;;  %v170_v41 = vld [vmem:[#allocation5 + $0x80] sm:$0xff]  ;;  %v129_v43 = vrot.slane %v1513_v39, 7  ;;  %v372_v48 = vld [vmem:[#allocation5 + $0x178] sm:$0xff] }
  0x31   :  { %1165 = vmatprep.subr.mxu1 %v163_v11  ;;  %1128 = vmatpush3.msra.mxu0 %v180_v10  ;;  %v154_v35 = vld [vmem:[#allocation5 + $0x8] sm:$0xff]  ;;  %v153_v42 = vld [vmem:[#allocation5] sm:$0xff]  ;;  %v141_v52 = vrot.slane %v1507_v32, 1  ;;  %v371_v53 = vld [vmem:[#allocation5 + $0x170] sm:$0xff]  ;;  %v142_v5 = vrot.slane %v1513_v39, 1  ;;  %v143_v9 = vrot.slane %v1505_v29, 1 }
  0x32   :  { %1166 = vmatpush3.msra.mxu1 %v163_v11  ;;  %1129 = vmatprep.subr.mxu0 %v179_v12  ;;  %v135_v46 = vsel %vm131_vm0, %v130_v38, %v127_v37  ;;  %v134_v47 = vsel %vm131_vm0, %v127_v37, %v128_v40  ;;  %v133_v50 = vsel %vm131_vm0, %v128_v40, %v129_v43  ;;  %v370_v55 = vld [vmem:[#allocation5 + $0x168] sm:$0xff]  ;;  %v369_v57 = vld [vmem:[#allocation5 + $0x160] sm:$0xff]  ;;  %v368_v58 = vld [vmem:[#allocation5 + $0x158] sm:$0xff]  ;;  %vm1555_vm4 = vcmp.ne.s32.totalorder %v82_v7, 15 }
  0x33   :  { %1167 = vmatprep.subr.mxu1 %v162_v13  ;;  %1130 = vmatpush3.msra.mxu0 %v179_v12  ;;  %v132_v54 = vsel %vm131_vm0, %v129_v43, %v130_v38  ;;  %v147_v56 = vsel %vm144_vm3, %v140_v51, %v141_v52  ;;  %v367_v59 = vld [vmem:[#allocation5 + $0x150] sm:$0xff]  ;;  %v366_v60 = vld [vmem:[#allocation5 + $0x148] sm:$0xff]  ;;  %v365_v61 = vld [vmem:[#allocation5 + $0x140] sm:$0xff]  ;;  %v146_v12 = vsel %vm144_vm3, %v141_v52, %v142_v5 }
  0x34   :  { %1168 = vmatpush3.msra.mxu1 %v162_v13  ;;  %1131 = vmatprep.subr.mxu0 %v178_v14  ;;  %v364_v62 = vld [vmem:[#allocation5 + $0x138] sm:$0xff]  ;;  %v363_v63 = vld [vmem:[#allocation5 + $0x130] sm:$0xff]  ;;  %v362_v0 = vld [vmem:[#allocation5 + $0x128] sm:$0xff]  ;;  %v96_v13 = vand.u32 15, %v70_v8 }
  0x35   :  { %1169 = vmatprep.subr.mxu1 %v161_v15  ;;  %1132 = vmatpush3.msra.mxu0 %v178_v14  ;;  %v361_v1 = vld [vmem:[#allocation5 + $0x120] sm:$0xff]  ;;  %v360_v2 = vld [vmem:[#allocation5 + $0x118] sm:$0xff]  ;;  %v359_v4 = vld [vmem:[#allocation5 + $0x110] sm:$0xff]  ;;  %v145_v14 = vsel %vm144_vm3, %v142_v5, %v143_v9 }
  0x36   :  { %1170 = vmatpush3.msra.mxu1 %v161_v15  ;;  %1133 = vmatprep.subr.mxu0 %v177_v16  ;;  %v358_v6 = vld [vmem:[#allocation5 + $0x108] sm:$0xff]  ;;  %v357_v10 = vld [vmem:[#allocation5 + $0x100] sm:$0xff]  ;;  %vm1567_vm5 = vcmp.ne.s32.totalorder %v96_v13, 15 }
  0x37   :  { %1171 = vmatprep.subr.mxu1 %v160_v17  ;;  %1134 = vmatpush3.msra.mxu0 %v177_v16  ;;  %v148_v16 = vsel %vm144_vm3, %v143_v9, %v140_v51  ;;  %v588_v13 = vld [vmem:[#allocation7 + $0xe8] sm:$0xff]  ;;  %v770_v49 = vld [vmem:[#allocation7 + $0x140] sm:$0xff] }
  0x38   :  { %1172 = vmatpush3.msra.mxu1 %v160_v17  ;;  %1135 = vmatprep.subr.mxu0 %v176_v18 }
  0x39   :  { %1173 = vmatprep.subr.mxu1 %v159_v19  ;;  %1136 = vmatpush3.msra.mxu0 %v176_v18 }
  0x3a   :  { %1174 = vmatpush3.msra.mxu1 %v159_v19  ;;  %1137 = vmatprep.subr.mxu0 %v175_v20 }
  0x3b   :  { %1175 = vmatprep.subr.mxu1 %v158_v21  ;;  %1138 = vmatpush3.msra.mxu0 %v175_v20 }
  0x3c   :  { %1176 = vmatpush3.msra.mxu1 %v158_v21  ;;  %1139 = vmatprep.subr.mxu0 %v174_v23 }
  0x3d   :  { %1177 = vmatprep.subr.mxu1 %v157_v24  ;;  %1140 = vmatpush3.msra.mxu0 %v174_v23 }
  0x3e   :  { %1178 = vmatpush3.msra.mxu1 %v157_v24  ;;  %1141 = vmatprep.subr.mxu0 %v173_v25 }
  0x3f   :  { %1179 = vmatprep.subr.mxu1 %v156_v26  ;;  %1142 = vmatpush3.msra.mxu0 %v173_v25 }
  0x40   :  { %1180 = vmatpush3.msra.mxu1 %v156_v26  ;;  %1143 = vmatprep.subr.mxu0 %v172_v30 }
  0x41   :  { %1181 = vmatprep.subr.mxu1 %v155_v31  ;;  %1144 = vmatpush3.msra.mxu0 %v172_v30 }
  0x42   :  { %1182 = vmatpush3.msra.mxu1 %v155_v31  ;;  %1145 = vmatprep.subr.mxu0 %v171_v34 }
  0x43   :  { %1183 = vmatprep.subr.mxu1 %v154_v35  ;;  %1146 = vmatpush3.msra.mxu0 %v171_v34 }
  0x44   :  { %1184 = vmatpush3.msra.mxu1 %v154_v35  ;;  %1147 = vmatprep.subr.mxu0 %v170_v41 }
  0x45   :  { %1185 = vmatprep.subr.mxu1 %v153_v42  ;;  %1148 = vmatpush3.msra.mxu0 %v170_v41 }
  0x46   :  { %1149 = vmatprep.mubr.f32.mxu0 %v1503_v28  ;;  %1186 = vmatpush3.msra.mxu1 %v153_v42 }
  0x47   :  { %1187 = vmatprep.mubr.msk.f32.mxu1 %vm1518_vm1, %v135_v46  ;;  %1150 = vmatmul.mubr.f32.vlgmr.msra.gmra.mxu0 %v1507_v32 }
  0x48   :  { %1188 = vmatmul.mubr.f32.vlgmr.msra.gmra.mxu1 %v134_v47  ;;  %1193 = vmatprep.subr.mxu0 %v372_v48 }
  0x49   :  { %1152 = vmatprep.mubr.f32.mxu0 %v1513_v39  ;;  %1194 = vmatpush3.msra.mxu0 %v372_v48 }
  0x4a   :  { %1190 = vmatprep.mubr.msk.f32.mxu1 %vm1529_vm2, %v133_v50  ;;  %1195 = vmatprep.subr.mxu0 %v371_v53 }
  0x4b   :  { %1196 = vmatpush3.msra.mxu0 %v371_v53 }
  0x4c   :  { %1191 = vmatmul.mubr.f32.gmra.mxu1 %v132_v54  ;;  %1197 = vmatprep.subr.mxu0 %v370_v55 }
  0x4d   :  { %1153 = vmatmul.mubr.f32.gmra.mxu0 %v1505_v29 }
  0x4e   :  { %1198 = vmatpush3.msra.mxu0 %v370_v55  ;;  %1225 = vmatprep.mubr.f32.mxu0 %v147_v56 }
  0x4f   :  { %1199 = vmatprep.subr.mxu0 %v369_v57 }
  0x50   :  { %1200 = vmatpush3.msra.mxu0 %v369_v57 }
  0x51   :  { %1201 = vmatprep.subr.mxu0 %v368_v58 }
  0x52   :  { %1202 = vmatpush3.msra.mxu0 %v368_v58 }
  0x53   :  { %1203 = vmatprep.subr.mxu0 %v367_v59 }
  0x54   :  { %1204 = vmatpush3.msra.mxu0 %v367_v59 }
  0x55   :  { %1205 = vmatprep.subr.mxu0 %v366_v60 }
  0x56   :  { %1206 = vmatpush3.msra.mxu0 %v366_v60 }
  0x57   :  { %1207 = vmatprep.subr.mxu0 %v365_v61 }
  0x58   :  { %1208 = vmatpush3.msra.mxu0 %v365_v61 }
  0x59   :  { %1209 = vmatprep.subr.mxu0 %v364_v62 }
  0x5a   :  { %1210 = vmatpush3.msra.mxu0 %v364_v62 }
  0x5b   :  { %1211 = vmatprep.subr.mxu0 %v363_v63 }
  0x5c   :  { %1212 = vmatpush3.msra.mxu0 %v363_v63 }
  0x5d   :  { %1213 = vmatprep.subr.mxu0 %v362_v0 }
  0x5e   :  { %1214 = vmatpush3.msra.mxu0 %v362_v0 }
  0x5f   :  { %1215 = vmatprep.subr.mxu0 %v361_v1 }
  0x60   :  { %1216 = vmatpush3.msra.mxu0 %v361_v1 }
  0x61   :  { %1217 = vmatprep.subr.mxu0 %v360_v2 }
  0x62   :  { %1218 = vmatpush3.msra.mxu0 %v360_v2 }
  0x63   :  { %1219 = vmatprep.subr.mxu0 %v359_v4 }
  0x64   :  { %1220 = vmatpush3.msra.mxu0 %v359_v4 }
  0x65   :  { %1221 = vmatprep.subr.mxu0 %v358_v6 }
  0x66   :  { %1222 = vmatpush3.msra.mxu0 %v358_v6 }
  0x67   :  { %1223 = vmatprep.subr.mxu0 %v357_v10 }
  0x68   :  { %1224 = vmatpush3.msra.mxu0 %v357_v10  ;;  %v590_v10 = vld [vmem:[#allocation7 + $0xf8] sm:$0xff] }
  0x69   :  { %1226 = vmatmul.mubr.msk.f32.vlgmr.msra.gmra.mxu0 %vm1555_vm4, %v146_v12  ;;  %1231 = vmatprep.subr.mxu1 %v590_v10  ;;  %v589_v12 = vld [vmem:[#allocation7 + $0xf0] sm:$0xff] }
  0x6a   :  { %1228 = vmatprep.mubr.f32.mxu0 %v145_v14  ;;  %1232 = vmatpush3.msra.mxu1 %v590_v10  ;;  %v573_v14 = vld [vmem:[#allocation7 + $0x78] sm:$0xff] }
  0x6b   :  { %1233 = vmatprep.subr.mxu1 %v589_v12  ;;  %1269 = vmatprep.subr.mxu0 %v573_v14 }
  0x6c   :  { %1234 = vmatpush3.msra.mxu1 %v589_v12  ;;  %1270 = vmatpush3.msra.mxu0 %v573_v14 }
  0x6d   :  { %1229 = vmatmul.mubr.msk.f32.gmra.mxu0 %vm1567_vm5, %v148_v16  ;;  %1235 = vmatprep.subr.mxu1 %v588_v13  ;;  %v587_v16 = vld [vmem:[#allocation7 + $0xe0] sm:$0xff] }
  0x6e   :  { %1236 = vmatpush3.msra.mxu1 %v588_v13 }
  0x6f   :  { %1237 = vmatprep.subr.mxu1 %v587_v16 }
  0x70   :  { %1238 = vmatpush3.msra.mxu1 %v587_v16 }
 0x107   :  { %v1151_v17 = vpop.f32.mrf.mxu0 }
 0x108   :  { %v1189_v18 = vpop.f32.mrf.mxu1 }
 0x109   :  { %v252_v19 = vpop.f32.mrf.mxu0  ;;  %v343_v25 = vadd.f32 %v1189_v18, %v1151_v17  ;;  %v572_v17 = vld [vmem:[#allocation7 + $0x70] sm:$0xff]  ;;  %v586_v18 = vld [vmem:[#allocation7 + $0xd8] sm:$0xff] }
 0x10a   :  { %v337_v21 = vpop.f32.mrf.mxu1  ;;  %1271 = vmatprep.subr.mxu0 %v572_v17  ;;  %1239 = vmatprep.subr.mxu1 %v586_v18 }
 0x10b   :  { %v338_v26 = vadd.f32 %v337_v21, %v252_v19  ;;  %1272 = vmatpush3.msra.mxu0 %v572_v17  ;;  %v571_v19 = vld [vmem:[#allocation7 + $0x68] sm:$0xff]  ;;  %1240 = vmatpush3.msra.mxu1 %v586_v18  ;;  %v570_v21 = vld [vmem:[#allocation7 + $0x60] sm:$0xff] }
 0x10c   :  { %v1192_v22 = vpop.f32.mrf.mxu1  ;;  %1273 = vmatprep.subr.mxu0 %v571_v19 }
 0x10d   :  { %v1154_v20 = vpop.f32.mrf.mxu0  ;;  %1274 = vmatpush3.msra.mxu0 %v571_v19 }
 0x10e   :  { %v347_v30 = vpop.f32.mrf.mxu1  ;;  %v353_v36 = vadd.f32 %v1192_v22, %v1154_v20  ;;  %v585_v20 = vld [vmem:[#allocation7 + $0xd0] sm:$0xff]  ;;  %1275 = vmatprep.subr.mxu0 %v570_v21 }
 0x10f   :  { %v262_v23 = vpop.f32.mrf.mxu0  ;;  %1241 = vmatprep.subr.mxu1 %v585_v20  ;;  %1276 = vmatpush3.msra.mxu0 %v570_v21 }
 0x110   :  { %v348_v37 = vadd.f32 %v347_v30, %v262_v23  ;;  %1242 = vmatpush3.msra.mxu1 %v585_v20  ;;  %v568_v30 = vld [vmem:[#allocation7 + $0x50] sm:$0xff] }
 0x129   :  { %v1227_v24 = vpop.f32.mrf.mxu0 }
 0x12a   :  { %v1577_v33 = vadd.f32 %v1227_v24, %v343_v25  ;;  %v584_v24 = vld [vmem:[#allocation7 + $0xc8] sm:$0xff]  ;;  %v569_v25 = vld [vmem:[#allocation7 + $0x58] sm:$0xff] }
 0x12b   :  { %v439_v31 = vpop.f32.mrf.mxu0  ;;  %1243 = vmatprep.subr.mxu1 %v584_v24  ;;  %1277 = vmatprep.subr.mxu0 %v569_v25 }
 0x12c   :  { %v1579_v34 = vadd.f32 %v439_v31, %v338_v26  ;;  %v472_v41 = vmul.f32 %v1577_v33, %v1577_v33  ;;  %v583_v26 = vld [vmem:[#allocation7 + $0xc0] sm:$0xff]  ;;  %1244 = vmatpush3.msra.mxu1 %v584_v24  ;;  %v582_v31 = vld [vmem:[#allocation7 + $0xb8] sm:$0xff]  ;;  %1278 = vmatpush3.msra.mxu0 %v569_v25 }
 0x12d   :  { %v1230_v35 = vpop.f32.mrf.mxu0  ;;  %1245 = vmatprep.subr.mxu1 %v583_v26  ;;  %1279 = vmatprep.subr.mxu0 %v568_v30 }
 0x12e   :  { %v471_v38 = vmul.f32 %v1579_v34, %v1579_v34  ;;  %v462_v42 = vadd.f32 %v1577_v33, %v1579_v34  ;;  %v1587_v43 = vadd.f32 %v1230_v35, %v353_v36  ;;  %v567_v36 = vld [vmem:[#allocation7 + $0x48] sm:$0xff]  ;;  %1246 = vmatpush3.msra.mxu1 %v583_v26  ;;  %1280 = vmatpush3.msra.mxu0 %v568_v30 }
 0x12f   :  { %v449_v40 = vpop.f32.mrf.mxu0  ;;  %1247 = vmatprep.subr.mxu1 %v582_v31  ;;  %1281 = vmatprep.subr.mxu0 %v567_v36  ;;  %v775_v26 = vld [vmem:[#allocation7 + $0x168] sm:$0xff] }
 0x130   :  { %v1589_v44 = vadd.f32 %v449_v40, %v348_v37  ;;  %v475_v46 = vadd.f32 %v472_v41, %v471_v38  ;;  %v474_v50 = vmul.f32 %v1587_v43, %v1587_v43  ;;  %v581_v38 = vld [vmem:[#allocation7 + $0xb0] sm:$0xff]  ;;  %v566_v40 = vld [vmem:[#allocation7 + $0x40] sm:$0xff]  ;;  %1248 = vmatpush3.msra.mxu1 %v582_v31  ;;  %1282 = vmatpush3.msra.mxu0 %v567_v36  ;;  %v580_v41 = vld [vmem:[#allocation7 + $0xa8] sm:$0xff] }
 0x131   :  { %1249 = vmatprep.subr.mxu1 %v581_v38  ;;  %1283 = vmatprep.subr.mxu0 %v566_v40 }
 0x132   :  { %v463_v47 = vadd.f32 %v462_v42, %v1589_v44  ;;  %v473_v48 = vmul.f32 %v1589_v44, %v1589_v44  ;;  %v565_v42 = vld [vmem:[#allocation7 + $0x38] sm:$0xff]  ;;  %1250 = vmatpush3.msra.mxu1 %v581_v38  ;;  %1284 = vmatpush3.msra.mxu0 %v566_v40  ;;  %v772_v40 = vld [vmem:[#allocation7 + $0x150] sm:$0xff] }
 0x133   :  { %1251 = vmatprep.subr.mxu1 %v580_v41  ;;  %1285 = vmatprep.subr.mxu0 %v565_v42  ;;  %v773_v38 = vld [vmem:[#allocation7 + $0x158] sm:$0xff] }
 0x134   :  { %v464_v51 = vadd.f32 %v463_v47, %v1587_v43  ;;  %v476_v52 = vadd.f32 %v475_v46, %v473_v48  ;;  %v579_v46 = vld [vmem:[#allocation7 + $0xa0] sm:$0xff]  ;;  %v564_v47 = vld [vmem:[#allocation7 + $0x30] sm:$0xff]  ;;  %1252 = vmatpush3.msra.mxu1 %v580_v41  ;;  %1286 = vmatpush3.msra.mxu0 %v565_v42  ;;  %v578_v48 = vld [vmem:[#allocation7 + $0x98] sm:$0xff] }
 0x135   :  { %1253 = vmatprep.subr.mxu1 %v579_v46  ;;  %1287 = vmatprep.subr.mxu0 %v564_v47  ;;  %v771_v41 = vld [vmem:[#allocation7 + $0x148] sm:$0xff]  ;;  %v769_v42 = vld [vmem:[#allocation7 + $0x138] sm:$0xff] }
 0x136   :  { %v465_v53 = vrot.slane %v464_v51, 4  ;;  %v477_v54 = vadd.f32 %v476_v52, %v474_v50  ;;  %v563_v50 = vld [vmem:[#allocation7 + $0x28] sm:$0xff]  ;;  %1254 = vmatpush3.msra.mxu1 %v579_v46  ;;  %1288 = vmatpush3.msra.mxu0 %v564_v47  ;;  %v562_v52 = vld [vmem:[#allocation7 + $0x20] sm:$0xff]  ;;  %v768_v46 = vld [vmem:[#allocation7 + $0x130] sm:$0xff] }
 0x137   :  { %1255 = vmatprep.subr.mxu1 %v578_v48  ;;  %1289 = vmatprep.subr.mxu0 %v563_v50  ;;  %v767_v47 = vld [vmem:[#allocation7 + $0x128] sm:$0xff] }
 0x138   :  { %v466_v55 = vadd.f32 %v465_v53, %v464_v51  ;;  %v478_v56 = vrot.slane %v477_v54, 4  ;;  %v577_v51 = vld [vmem:[#allocation7 + $0x90] sm:$0xff]  ;;  %1256 = vmatpush3.msra.mxu1 %v578_v48  ;;  %1290 = vmatpush3.msra.mxu0 %v563_v50  ;;  %v576_v53 = vld [vmem:[#allocation7 + $0x88] sm:$0xff]  ;;  %v766_v48 = vld [vmem:[#allocation7 + $0x120] sm:$0xff] }
 0x139   :  { %1257 = vmatprep.subr.mxu1 %v577_v51  ;;  %1291 = vmatprep.subr.mxu0 %v562_v52  ;;  %v765_v50 = vld [vmem:[#allocation7 + $0x118] sm:$0xff] }
 0x13a   :  { %v467_v57 = vrot.slane %v466_v55, 2  ;;  %v479_v58 = vadd.f32 %v478_v56, %v477_v54  ;;  %v561_v54 = vld [vmem:[#allocation7 + $0x18] sm:$0xff]  ;;  %1258 = vmatpush3.msra.mxu1 %v577_v51  ;;  %1292 = vmatpush3.msra.mxu0 %v562_v52  ;;  %v560_v56 = vld [vmem:[#allocation7 + $0x10] sm:$0xff]  ;;  %v763_v52 = vld [vmem:[#allocation7 + $0x108] sm:$0xff] }
 0x13b   :  { %1259 = vmatprep.subr.mxu1 %v576_v53  ;;  %1293 = vmatprep.subr.mxu0 %v561_v54  ;;  %v764_v51 = vld [vmem:[#allocation7 + $0x110] sm:$0xff] }
 0x13c   :  { %v468_v59 = vadd.f32 %v467_v57, %v466_v55  ;;  %v480_v60 = vrot.slane %v479_v58, 2  ;;  %v575_v55 = vld [vmem:[#allocation7 + $0x80] sm:$0xff]  ;;  %1260 = vmatpush3.msra.mxu1 %v576_v53  ;;  %1294 = vmatpush3.msra.mxu0 %v561_v54  ;;  %v559_v57 = vld [vmem:[#allocation7 + $0x8] sm:$0xff] }
 0x13d   :  { %1261 = vmatprep.subr.mxu1 %v575_v55  ;;  %1295 = vmatprep.subr.mxu0 %v560_v56  ;;  %v762_v54 = vld [vmem:[#allocation7 + $0x100] sm:$0xff] }
 0x13e   :  { %v469_v61 = vrot.slane %v468_v59, 1  ;;  %v481_v62 = vadd.f32 %v480_v60, %v479_v58  ;;  %v777_v58 = vld [vmem:[#allocation7 + $0x178] sm:$0xff]  ;;  %1262 = vmatpush3.msra.mxu1 %v575_v55  ;;  %1296 = vmatpush3.msra.mxu0 %v560_v56 }
 0x13f   :  { %1297 = vmatprep.subr.mxu0 %v559_v57  ;;  %1307 = vmatprep.subr.mxu1 %v777_v58 }
 0x140   :  { %v470_v63 = vadd.f32 %v469_v61, %v468_v59  ;;  %v482_v0 = vrot.slane %v481_v62, 1  ;;  %1298 = vmatpush3.msra.mxu0 %v559_v57  ;;  %v558_v59 = vld [vmem:[#allocation7] sm:$0xff] }
 0x141   :  { %1299 = vmatprep.subr.mxu0 %v558_v59 }
 0x142   :  { %484 = vrot.lane.b32.xlu0 %v470_v63, %s1447_s24  ;;  %v483_v1 = vadd.f32 %v482_v0, %v481_v62  ;;  %1300 = vmatpush3.msra.mxu0 %v558_v59 }
 0x146   :  { %487 = vrot.lane.b32.xlu0 %v483_v1, %s1447_s24 }
 0x1b4   :  { %v485_v2 = vpop.permute.xlu0 %484 }
 0x1b5   :  { %v486_v3 = vadd.f32 %v485_v2, %v470_v63 }
 0x1b7   :  { %490 = vrot.lane.b32.xlu1 %v486_v3, %s1449_s0 }
 0x1b8   :  { %v488_v4 = vpop.permute.xlu0 %487 }
 0x1b9   :  { %v489_v5 = vadd.f32 %v488_v4, %v483_v1 }
 0x1bb   :  { %493 = vrot.lane.b32.xlu1 %v489_v5, %s1449_s0 }
 0x229   :  { %v491_v6 = vpop.permute.xlu1 %490 }
 0x22a   :  { %v492_v7 = vadd.f32 %v491_v6, %v486_v3 }
 0x22c   :  { %496 = vrot.lane.b32.xlu0 %v492_v7, %s1450_s2 }
 0x22d   :  { %v494_v8 = vpop.permute.xlu1 %493 }
 0x22e   :  { %v495_v9 = vadd.f32 %v494_v8, %v489_v5  ;;  %v1614_v5 = vsub.s32 0, %v1501_v27 }
 0x230   :  { %499 = vrot.lane.b32.xlu1 %v495_v9, %s1450_s2 }
 0x29e   :  { %v497_v22 = vpop.permute.xlu0 %496 }
 0x29f   :  { %v1603_v23 = vadd.f32 %v497_v22, %v492_v7 }
 0x2a1   :  { %502 = vrot.lane.b32.xlu0 %v1603_v23, %s1451_s9 }
 0x2a2   :  { %v500_v35 = vpop.permute.xlu1 %499 }
 0x2a3   :  { %v1607_v37 = vadd.f32 %v500_v35, %v495_v9  ;;  %v774_v35 = vld [vmem:[#allocation7 + $0x160] sm:$0xff] }
 0x2a5   :  { %505 = vrot.lane.b32.xlu1 %v1607_v37, %s1451_s9 }
 0x313   :  { %v503_v60 = vpop.permute.xlu0 %502 }
 0x314   :  { %v504_v61 = vadd.f32 %v503_v60, %v1603_v23 }
 0x316   :  { %v508_v62 = vmul.f32 0.001953125, %v504_v61 }
 0x317   :  { %v506_v63 = vpop.permute.xlu1 %505 }
 0x318   :  { %v507_v0 = vadd.f32 %v506_v63, %v1607_v37  ;;  %v510_v1 = vmul.f32 %v508_v62, %v508_v62  ;;  %v517_v6 = vrot.slane %v508_v62, %v1614_v5 }
 0x31a   :  { %v509_v2 = vmul.f32 0.001953125, %v507_v0  ;;  %v519_v8 = vsub.f32 %v1577_v33, %v517_v6  ;;  %v521_v9 = vsub.f32 %v1587_v43, %v517_v6  ;;  %v518_v10 = vsub.f32 %v1579_v34, %v517_v6  ;;  %v776_v33 = vld [vmem:[#allocation7 + $0x170] sm:$0xff] }
 0x31b   :  { %v520_v13 = vsub.f32 %v1589_v44, %v517_v6 }
 0x31c   :  { %v511_v3 = vsub.f32 %v509_v2, %v510_v1 }
 0x31e   :  { %v512_v4 = vadd.f32 1e-05, %v511_v3 }
 0x320   :  { %1354 = vrsqrt.f32 %v512_v4 }
 0x32d   :  { %v1355_v7 = vpop.eup %1354 }
 0x32e   :  { %v525_v12 = vrot.slane %v1355_v7, %v1614_v5 }
 0x330   :  { %v526_v14 = vmul.f32 %v525_v12, %v518_v10  ;;  %v527_v16 = vmul.f32 %v525_v12, %v519_v8  ;;  %v528_v17 = vmul.f32 %v525_v12, %v520_v13  ;;  %v529_v18 = vmul.f32 %v525_v12, %v521_v9 }
 0x332   :  { %v1622_v19 = vmax.f32 %v526_v14, 0.0  ;;  %v1624_v20 = vmax.f32 %v527_v16, 0.0  ;;  %v1626_v21 = vmax.f32 %v528_v17, 0.0  ;;  %v1628_v22 = vmax.f32 %v529_v18, 0.0 }
 0x334   :  { %1263 = vmatprep.mubr.f32.mxu1 %v1622_v19  ;;  %v534_v34 = vrot.slane %v1622_v19, 7  ;;  %v537_v43 = vrot.slane %v1628_v22, 7  ;;  %v535_v44 = vrot.slane %v1624_v20, 7  ;;  %v536_v23 = vrot.slane %v1626_v21, 7 }
 0x335   :  { %1264 = vmatmul.mubr.f32.vlgmr.msra.gmra.mxu1 %v1624_v20  ;;  %v546_v30 = vrot.slane %v1622_v19, 1  ;;  %v547_v31 = vrot.slane %v1624_v20, 1  ;;  %v548_v53 = vrot.slane %v1626_v21, 1  ;;  %v549_v55 = vrot.slane %v1628_v22, 1 }
 0x336   :  { %1308 = vmatpush3.msra.mxu1 %v777_v58  ;;  %1266 = vmatprep.mubr.f32.mxu1 %v1626_v21  ;;  %v541_v24 = vsel %vm131_vm0, %v537_v43, %v534_v34  ;;  %v540_v25 = vsel %vm131_vm0, %v534_v34, %v535_v44  ;;  %v539_v36 = vsel %vm131_vm0, %v535_v44, %v536_v23 }
 0x337   :  { %1309 = vmatprep.subr.mxu1 %v776_v33  ;;  %1301 = vmatprep.mubr.msk.f32.mxu0 %vm1518_vm1, %v541_v24  ;;  %v552_v37 = vsel %vm144_vm3, %v546_v30, %v547_v31  ;;  %v538_v45 = vsel %vm131_vm0, %v536_v23, %v537_v43  ;;  %v551_v56 = vsel %vm144_vm3, %v547_v31, %v548_v53 }
 0x338   :  { %1310 = vmatpush3.msra.mxu1 %v776_v33  ;;  %1302 = vmatmul.mubr.f32.vlgmr.msra.gmra.mxu0 %v540_v25  ;;  %v550_v57 = vsel %vm144_vm3, %v548_v53, %v549_v55  ;;  %v553_v58 = vsel %vm144_vm3, %v549_v55, %v546_v30 }
 0x339   :  { %1311 = vmatprep.subr.mxu1 %v775_v26  ;;  %1267 = vmatmul.mubr.f32.gmra.mxu1 %v1628_v22 }
 0x33a   :  { %1304 = vmatprep.mubr.msk.f32.mxu0 %vm1529_vm2, %v539_v36  ;;  %1312 = vmatpush3.msra.mxu1 %v775_v26 }
 0x33b   :  { %1313 = vmatprep.subr.mxu1 %v774_v35  ;;  %1339 = vmatprep.mubr.f32.mxu1 %v552_v37 }
 0x33c   :  { %1314 = vmatpush3.msra.mxu1 %v774_v35  ;;  %1305 = vmatmul.mubr.f32.gmra.mxu0 %v538_v45 }
 0x33d   :  { %1315 = vmatprep.subr.mxu1 %v773_v38 }
 0x33e   :  { %1316 = vmatpush3.msra.mxu1 %v773_v38 }
 0x33f   :  { %1317 = vmatprep.subr.mxu1 %v772_v40 }
 0x340   :  { %1318 = vmatpush3.msra.mxu1 %v772_v40 }
 0x341   :  { %1319 = vmatprep.subr.mxu1 %v771_v41 }
 0x342   :  { %1320 = vmatpush3.msra.mxu1 %v771_v41 }
 0x343   :  { %1321 = vmatprep.subr.mxu1 %v770_v49 }
 0x344   :  { %1322 = vmatpush3.msra.mxu1 %v770_v49 }
 0x345   :  { %1323 = vmatprep.subr.mxu1 %v769_v42 }
 0x346   :  { %1324 = vmatpush3.msra.mxu1 %v769_v42 }
 0x347   :  { %1325 = vmatprep.subr.mxu1 %v768_v46 }
 0x348   :  { %1326 = vmatpush3.msra.mxu1 %v768_v46 }
 0x349   :  { %1327 = vmatprep.subr.mxu1 %v767_v47 }
 0x34a   :  { %1328 = vmatpush3.msra.mxu1 %v767_v47 }
 0x34b   :  { %1329 = vmatprep.subr.mxu1 %v766_v48 }
 0x34c   :  { %1330 = vmatpush3.msra.mxu1 %v766_v48 }
 0x34d   :  { %1331 = vmatprep.subr.mxu1 %v765_v50 }
 0x34e   :  { %1332 = vmatpush3.msra.mxu1 %v765_v50 }
 0x34f   :  { %1333 = vmatprep.subr.mxu1 %v764_v51 }
 0x350   :  { %1334 = vmatpush3.msra.mxu1 %v764_v51 }
 0x351   :  { %1335 = vmatprep.subr.mxu1 %v763_v52 }
 0x352   :  { %1336 = vmatpush3.msra.mxu1 %v763_v52 }
 0x353   :  { %1337 = vmatprep.subr.mxu1 %v762_v54 }
 0x354   :  { %1338 = vmatpush3.msra.mxu1 %v762_v54 }
 0x355   :  { %1340 = vmatmul.mubr.msk.f32.vlgmr.msra.gmra.mxu1 %vm1555_vm4, %v551_v56 }
 0x356   :  { %1342 = vmatprep.mubr.f32.mxu1 %v550_v57 }
 0x359   :  { %1343 = vmatmul.mubr.msk.f32.gmra.mxu1 %vm1567_vm5, %v553_v58 }
 0x3f5   :  { %v1265_v59 = vpop.f32.mrf.mxu1 }
 0x3f7   :  { %v657_v60 = vpop.f32.mrf.mxu1 }
 0x3f8   :  { %v1303_v61 = vpop.f32.mrf.mxu0 }
 0x3f9   :  { %v1268_v62 = vpop.f32.mrf.mxu1  ;;  %v748_v11 = vadd.f32 %v1303_v61, %v1265_v59 }
 0x3fa   :  { %v742_v63 = vpop.f32.mrf.mxu0 }
 0x3fb   :  { %v667_v0 = vpop.f32.mrf.mxu1  ;;  %v743_v3 = vadd.f32 %v742_v63, %v657_v60 }
 0x3fc   :  { %v1306_v1 = vpop.f32.mrf.mxu0 }
 0x3fd   :  { %v758_v9 = vadd.f32 %v1306_v1, %v1268_v62 }
 0x3fe   :  { %v752_v4 = vpop.f32.mrf.mxu0 }
 0x3ff   :  { %v753_v15 = vadd.f32 %v752_v4, %v667_v0 }
 0x415   :  { %v1341_v2 = vpop.f32.mrf.mxu1 }
 0x416   :  { %v1666_v7 = vadd.f32 %v1341_v2, %v748_v11 }
 0x417   :  { %v844_v6 = vpop.f32.mrf.mxu1 }
 0x418   :  { %v1668_v8 = vadd.f32 %v844_v6, %v743_v3  ;;  %v877_v13 = vmul.f32 %v1666_v7, %v1666_v7  ;;  %v995_v6 = vld [vmem:[%s1713_s3] ss:$0 sm:$0xff]  ;;  %s1418_s3 = scalar_lea.vmem %s975_s15, 512 }
 0x419   :  { %v1344_v27 = vpop.f32.mrf.mxu1  ;;  %p1419_p1 = scmp.ne.s32.totalorder %s975_s15, %s1418_s3  ;;  %p1424_p3 = scmp.lt.s32.totalorder %s1418_s3, %s1418_s3 }
 0x41a   :  { %v876_v10 = vmul.f32 %v1668_v8, %v1668_v8  ;;  %v867_v14 = vadd.f32 %v1666_v7, %v1668_v8  ;;  %v1676_v16 = vadd.f32 %v1344_v27, %v758_v9 }
 0x41b   :  { %v854_v12 = vpop.f32.mrf.mxu1  ;;  %p1425_p4 = por %p1424_p3, %p1423_p2 }
 0x41c   :  { %v865_v17 = vadd.f32 %v854_v12, %v753_v15  ;;  %v880_v18 = vadd.f32 %v877_v13, %v876_v10  ;;  %v879_v21 = vmul.f32 %v1676_v16, %v1676_v16  ;;  %v996_v12 = vld [vmem:[%s1714_s4] ss:$0 sm:$0xff] }
 0x41d   :  { %p1426_p5 = pnand %p1425_p4, %p1419_p1 }
 0x41e   :  { %v868_v19 = vadd.f32 %v867_v14, %v865_v17  ;;  %v878_v20 = vmul.f32 %v865_v17, %v865_v17 }
 0x420   :  { %v869_v22 = vadd.f32 %v868_v19, %v1676_v16  ;;  %v881_v33 = vadd.f32 %v880_v18, %v878_v20 }
 0x422   :  { %v870_v34 = vrot.slane %v869_v22, 4  ;;  %v882_v43 = vadd.f32 %v881_v33, %v879_v21 }
 0x424   :  { %v871_v44 = vadd.f32 %v870_v34, %v869_v22  ;;  %v883_v23 = vrot.slane %v882_v43, 4 }
 0x426   :  { %v872_v24 = vrot.slane %v871_v44, 2  ;;  %v884_v25 = vadd.f32 %v883_v23, %v882_v43 }
 0x428   :  { %v873_v26 = vadd.f32 %v872_v24, %v871_v44  ;;  %v885_v30 = vrot.slane %v884_v25, 2 }
 0x42a   :  { %v874_v31 = vrot.slane %v873_v26, 1  ;;  %v886_v35 = vadd.f32 %v885_v30, %v884_v25 }
 0x42c   :  { %v875_v36 = vadd.f32 %v874_v31, %v873_v26  ;;  %v887_v37 = vrot.slane %v886_v35, 1 }
 0x42e   :  { %889 = vrot.lane.b32.xlu0 %v875_v36, %s1447_s24  ;;  %v888_v38 = vadd.f32 %v887_v37, %v886_v35 }
 0x430   :  { %892 = vrot.lane.b32.xlu1 %v888_v38, %s1447_s24 }
 0x4a0   :  { %v890_v45 = vpop.permute.xlu0 %889 }
 0x4a1   :  { %v891_v40 = vadd.f32 %v890_v45, %v875_v36 }
 0x4a2   :  { %v893_v41 = vpop.permute.xlu1 %892 }
 0x4a3   :  { %v894_v49 = vadd.f32 %v893_v41, %v888_v38  ;;  %895 = vrot.lane.b32.xlu0 %v891_v40, %s1449_s0 }
 0x4a5   :  { %898 = vrot.lane.b32.xlu1 %v894_v49, %s1449_s0 }
 0x515   :  { %v896_v42 = vpop.permute.xlu0 %895 }
 0x516   :  { %v897_v46 = vadd.f32 %v896_v42, %v891_v40 }
 0x517   :  { %v899_v47 = vpop.permute.xlu1 %898 }
 0x518   :  { %v900_v48 = vadd.f32 %v899_v47, %v894_v49  ;;  %901 = vrot.lane.b32.xlu0 %v897_v46, %s1450_s2 }
 0x51a   :  { %904 = vrot.lane.b32.xlu1 %v900_v48, %s1450_s2 }
 0x58a   :  { %v902_v50 = vpop.permute.xlu0 %901 }
 0x58b   :  { %v903_v51 = vadd.f32 %v902_v50, %v897_v46 }
 0x58c   :  { %v905_v52 = vpop.permute.xlu1 %904 }
 0x58d   :  { %v906_v53 = vadd.f32 %v905_v52, %v900_v48  ;;  %907 = vrot.lane.b32.xlu0 %v903_v51, %s1451_s9 }
 0x58f   :  { %910 = vrot.lane.b32.xlu1 %v906_v53, %s1451_s9 }
 0x5ff   :  { %v908_v54 = vpop.permute.xlu0 %907 }
 0x600   :  { %v909_v55 = vadd.f32 %v908_v54, %v903_v51 }
 0x601   :  { %v911_v56 = vpop.permute.xlu1 %910 }
 0x602   :  { %v913_v57 = vmul.f32 0.001953125, %v909_v55  ;;  %v912_v58 = vadd.f32 %v911_v56, %v906_v53 }
 0x604   :  { %v915_v59 = vmul.f32 %v913_v57, %v913_v57  ;;  %v914_v60 = vmul.f32 0.001953125, %v912_v58  ;;  %v922_v63 = vrot.slane %v913_v57, %v1614_v5 }
 0x606   :  { %v916_v61 = vsub.f32 %v914_v60, %v915_v59  ;;  %v923_v1 = vsub.f32 %v1668_v8, %v922_v63  ;;  %v924_v2 = vsub.f32 %v1666_v7, %v922_v63  ;;  %v925_v11 = vsub.f32 %v865_v17, %v922_v63 }
 0x607   :  { %v926_v3 = vsub.f32 %v1676_v16, %v922_v63 }
 0x608   :  { %v917_v62 = vadd.f32 1e-05, %v916_v61 }
 0x60a   :  { %1356 = vrsqrt.f32 %v917_v62 }
 0x617   :  { %v1357_v0 = vpop.eup %1356 }
 0x618   :  { %v930_v4 = vrot.slane %v1357_v0, %v1614_v5 }
 0x61a   :  { %v931_v27 = vmul.f32 %v930_v4, %v923_v1  ;;  %v932_v9 = vmul.f32 %v930_v4, %v924_v2  ;;  %v933_v15 = vmul.f32 %v930_v4, %v925_v11  ;;  %v934_v10 = vmul.f32 %v930_v4, %v926_v3 }
 0x61c   :  { %v942_v8 = vmul.f32 %v995_v6, %v931_v27  ;;  %v943_v13 = vmul.f32 %v995_v6, %v932_v9  ;;  %v944_v7 = vmul.f32 %v995_v6, %v933_v15  ;;  %v945_v14 = vmul.f32 %v995_v6, %v934_v10 }
 0x61e   :  { %v953_v17 = vadd.f32 %v996_v12, %v942_v8  ;;  %v954_v16 = vadd.f32 %v996_v12, %v943_v13  ;;  %v955_v18 = vadd.f32 %v996_v12, %v944_v7  ;;  %v956_v5 = vadd.f32 %v996_v12, %v945_v14 }
 0x620   :  { %v957_v19 = vadd.f32 %v953_v17, %v1503_v28  ;;  %v958_v20 = vadd.f32 %v954_v16, %v1507_v32  ;;  %v959_v21 = vadd.f32 %v955_v18, %v1513_v39  ;;  %v960_v22 = vadd.f32 %v956_v5, %v1505_v29 }
 0x622   :  { %v961_v33 = vmax.f32 %v957_v19, 0.0  ;;  %v962_v34 = vmax.f32 %v958_v20, 0.0  ;;  %v963_v43 = vmax.f32 %v959_v21, 0.0  ;;  %v964_v44 = vmax.f32 %v960_v22, 0.0 }
 0x624   :  { %965 = vst [vmem:[#allocation8] sm:$0xff] %v961_v33  ;;  %966 = vst [vmem:[#allocation8 + $0x8] sm:$0xff] %v962_v34 }
 0x625   :  { %967 = vst [vmem:[#allocation8 + $0x10] sm:$0xff] %v963_v43  ;;  %968 = vst [vmem:[#allocation8 + $0x18] sm:$0xff] %v964_v44 }
 0x626   :  { %1429 = shalt.err (!%p1426_p5)
}
 0x627   :  { %980 = dma.vmem_to_hbm [thread:$0]  %s975_s15, 512, %s1715_s5, [#allocation4], %s1446_s23, %s1446_s23, %s1447_s24  }
 0x628   :  { %1442 = dma.done.wait [#allocation4], 512  }
 0x629   :  { %1443 = vsyncadd [#allocation4], 4294966784 }
 0x62a   :  { %984 = vsyncpa [#allocation3], 1 }
 0x62b   :  { %985 = vsyncpa [#allocation6], 1 }
 0x62c   :  { %986 = vsyncpa [#allocation4], 1 }

</bundles_post_ra>
